<compile_context>
chip_gen: v5e
topology: v5e:2x2
jax: 0.10.0
libtpu: 0.0.40
codegen_flags: <defaults>
</compile_context>

<pallas_src>
import numpy as np
import jax
import jax.numpy as jnp
from jax.experimental import pallas as pl
from jax.experimental.pallas import tpu as pltpu


# Matches torch: torch.where(tq < tk, float('-inf'), 0.0).  Swap for a large finite
# negative (e.g. -1e9) if a downstream softmax row can ever be fully masked.
_MASK_FILL = float('-inf')


def _vmem():
    return pl.BlockSpec(memory_space=pltpu.MemorySpace.VMEM)


# -----------------------------------------------------------------------------
# Fused kernel:
#   1) tf_in_pos = [seq_in | onehot(t) | 1] @ [W ; PE ; b]   (single MXU matmul)
#   2) self_other_mask (0/1) and src_mask (causal/zero) in one f32 [T, 2T] slab
#   3) agent_context = identity-grouped mean pool of tf_in_pos (MXU sum + exact divide)
# -----------------------------------------------------------------------------
def _make_fused_kernel(causal: bool, pe_col_offset: int):
    # Refs:
    #   lhs_ref  : [T, K_aug] f32  seq features in cols [0, in_dim), zeros elsewhere
    #   w_ref    : [K_aug, D] f32  rows = [W_in ; PE table ; bias]
    #   col_ref  : [T, 3]     i32  cols = (timesteps, identities, padded unique ids)
    #   key_ref  : [1, 2T]    i32  lanes = [identities | timesteps]
    #   enc_ref  : [T, D]     f32  out (tf_in_pos / context_enc)
    #   mask_ref : [T, 2T]    f32  out ([self_other 0/1 | src_mask additive])
    #   agent_ref: [N, D]     f32  out (agent_context)
    def kernel(lhs_ref, w_ref, col_ref, key_ref, enc_ref, mask_ref, agent_ref):
        T, K_aug = lhs_ref.shape
        N = agent_ref.shape[0]

        # --- 1) input_fc + positional encoding + bias: ONE MXU push ------------------
        # Complete the LHS with the PE one-hot column and the bias "ones" column.
        # Note: an out-of-range (times + shift) yields no PE column match (PyTorch
        # indexing would raise); inputs are assumed within the timestep window.
        jj = jax.lax.broadcasted_iota(jnp.int32, (T, K_aug), 1)
        t_idx = col_ref[:, 0:1] + pe_col_offset                       # PE column per row
        sel = (jj == t_idx) | (jj == K_aug - 1)                       # PE one-hot + bias col
        lhs = lhs_ref[...] + sel.astype(jnp.float32)
        # At realistic D (256), cast operands to bf16 here (keep preferred f32 acc).
        enc = jnp.dot(lhs, w_ref[...], preferred_element_type=jnp.float32)   # [T, D]
        enc_ref[...] = enc

        # --- 2) attention masks: one f32 slab, one full-width store ------------------
        key = key_ref[...]                                            # [1, 2T] [ids|times]
        half = jax.lax.broadcasted_iota(jnp.int32, (T, 2 * T), 1) >= T   # True = src half
        i_col = col_ref[:, 1:2]                                       # [T, 1] identities
        so_val = (i_col == key).astype(jnp.float32)                   # valid on left half
        if causal:
            t_col = col_ref[:, 0:1]                                   # [T, 1] timesteps
            src_val = jnp.where(t_col < key,
                                jnp.float32(_MASK_FILL), jnp.float32(0.0))
            mask_ref[...] = jnp.where(half, src_val, so_val)
        else:
            mask_ref[...] = jnp.where(half, jnp.float32(0.0), so_val)

        # --- 3) identity-grouped mean pooling (over the pass-through context enc) ----
        uid = col_ref[0:N, 2:3]                                       # [N, 1]
        i_row = key_ref[0:1, 0:T]                                     # [1, T] identities
        pool_mask = (uid == i_row).astype(jnp.float32)                # [N, T]
        counts = jnp.sum(pool_mask, axis=-1, keepdims=True)           # [N, 1]
        summed = jnp.dot(pool_mask, enc, preferred_element_type=jnp.float32)   # [N, D]
        # Exact divide (review: approx reciprocal bias removed; [N,1] work is negligible).
        agent_ref[...] = summed / jnp.maximum(counts, jnp.float32(1.0))
    return kernel


def context_encoder_fused(lhs, w_aug, col_int, key_row, n_agents,
                          *, causal: bool, pe_col_offset: int):
    T, K_aug = lhs.shape
    D = w_aug.shape[1]
    N = int(n_agents)

    out_shape = (
        jax.ShapeDtypeStruct((T, D), jnp.float32),        # tf_in_pos / context_enc
        jax.ShapeDtypeStruct((T, 2 * T), jnp.float32),    # [self_other | src_mask]
        jax.ShapeDtypeStruct((N, D), jnp.float32),        # agent_context
    )
    flops = 2 * T * K_aug * D + 2 * N * T * D + 6 * T * T
    bytes_accessed = 4 * (T * K_aug + K_aug * D + 3 * T + 2 * T
                          + T * D + 2 * T * T + N * D)
    return pl.pallas_call(
        _make_fused_kernel(bool(causal), int(pe_col_offset)),
        out_shape=out_shape,
        in_specs=[_vmem() for _ in range(4)],
        out_specs=tuple(_vmem() for _ in range(3)),
        cost_estimate=pl.CostEstimate(flops=flops, transcendentals=0,
                                      bytes_accessed=bytes_accessed),
    )(lhs, w_aug, col_int, key_row)


# -----------------------------------------------------------------------------
# PositionalEncoding table (matches PositionalEncoding.build_enc_table)
# -----------------------------------------------------------------------------
def build_pe_table(d_model, timestep_window=(0, 20)):
    tw = np.arange(*timestep_window, dtype=np.float32)
    pe = np.zeros((tw.shape[0], d_model), dtype=np.float32)
    div = np.exp(np.arange(0, d_model, 2, dtype=np.float32) * (-np.log(10000.0) / d_model))
    pe[:, 0::2] = np.sin(tw[:, None] * div)
    pe[:, 1::2] = np.cos(tw[:, None] * div)
    return jnp.asarray(pe)


# -----------------------------------------------------------------------------
# ContextEncoder wrapper (B == 1, as the PyTorch module assumes)
# -----------------------------------------------------------------------------
class ContextEncoderPallas:
    def __init__(self, ctx, key):
        self.ctx = ctx
        self.motion_dim = ctx['motion_dim']
        self.model_dim = ctx['tf_model_dim']
        self.input_type = ctx['input_type']
        self.input_impute_markers = ctx['input_impute_markers']
        self.causal_attention = ctx['causal_attention']
        self.t_zero_index = ctx['t_zero_index']
        self.timestep_window = (0, 20)
        self.t_index_shift = self.t_zero_index - self.timestep_window[0]

        self.in_dim = self.motion_dim * len(self.input_type) + int(self.input_impute_markers)
        k1, k2 = jax.random.split(key)
        bound = 1.0 / np.sqrt(self.in_dim)
        # deterministic synthetic init (uniform, like nn.Linear default)
        self.w_in = jax.random.uniform(k1, (self.in_dim, self.model_dim), jnp.float32, -bound, bound)
        self.b_in = jax.random.uniform(k2, (1, self.model_dim), jnp.float32, -bound, bound)
        self.pe = build_pe_table(self.model_dim, self.timestep_window)
        self.pe_len = self.pe.shape[0]
        # Fused weight [W ; PE ; b]: one MXU matmul handles input_fc + PE select + bias.
        self.w_aug = jnp.concatenate([self.w_in, self.pe, self.b_in], axis=0)
        # dropout (p = ctx['tf_dropout']) is identity in eval mode.

    def __call__(self, data):
        # --- gather + concat inputs (glue) ---
        seq_in = [data[f'obs_{key}_sequence'] for key in self.input_type]
        if self.input_impute_markers:
            seq_in.append(data['obs_imputation_sequence'])
        seq_in_2d = jnp.concatenate(seq_in, axis=-1)[0]               # [T, in_dim] f32
        T = seq_in_2d.shape[0]

        times = data['obs_timestep_sequence'][0].astype(jnp.int32)    # [T]
        ids = data['obs_identity_sequence'][0].astype(jnp.int32)      # [T]
        # By the module's own assert, unique(identities) == valid_id (sorted unique ids).
        unique_ids = data['valid_id'][0].astype(jnp.int32)            # [N]
        N = unique_ids.shape[0]

        # Pack kernel inputs: seq pre-padded with zero PE/bias columns (the kernel only
        # adds the one-hot), one col-form int array, one row-form int array.
        lhs = jnp.concatenate(
            [seq_in_2d, jnp.zeros((T, self.pe_len + 1), seq_in_2d.dtype)], axis=-1)
        col_int = jnp.stack([times, ids, jnp.pad(unique_ids, (0, T - N))], axis=1)  # [T,3]
        key_row = jnp.concatenate([ids, times], axis=0)[None, :]                    # [1,2T]

        enc, mask_slab, agent_ctx = context_encoder_fused(
            lhs, self.w_aug, col_int, key_row, N,
            causal=self.causal_attention,
            pe_col_offset=self.t_index_shift + self.in_dim)

        # self_other_mask is exposed as 0/1 f32 (review: no int8 pack in-kernel, no
        # wrapper bool round-trip); a downstream attention kernel consumes it directly
        # (or regenerates it flash-style from the identity vector at scale).
        data['self_other_mask'] = mask_slab[:, :T][None]               # [1, T, T] f32 0/1
        data['src_mask'] = mask_slab[:, T:][None]                      # [1, T, T] f32 additive
        # --- transformer encoder ---
        # TODO(synk): encoder stack definition not provided; pass-through.
        data['context_enc'] = enc[None]                                # [1, T, D]
        data['agent_context'] = agent_ctx[None]                        # [1, N, D]
        return data


# -----------------------------------------------------------------------------
if __name__ == "__main__":
    ctx = {
        'motion_dim': 2,
        'tf_model_dim': 32,
        'tf_ff_dim': 64,
        'tf_n_head': 4,
        'tf_dropout': 0.1,
        'context_encoder': {'n_layer': 2, 'pooling': 'mean'},
        'input_type': ['pos', 'vel'],
        'input_impute_markers': False,
        'global_map_attention': False,
        'causal_attention': True,
        'pos_concat': False,
        't_zero_index': 7,
    }

    key = jax.random.PRNGKey(0)
    k_enc, k_pos, k_vel = jax.random.split(key, 3)

    T = 16  # total sequence length (agent-time pairs), B = 1
    data = {
        'obs_pos_sequence': jax.random.normal(k_pos, (1, T, ctx['motion_dim']), jnp.float32),
        'obs_vel_sequence': jax.random.normal(k_vel, (1, T, ctx['motion_dim']), jnp.float32),
        # 3 agents with their own (causally ordered) observation timesteps
        'obs_identity_sequence': jnp.asarray(
            [[1, 1, 1, 1, 1, 2, 2, 2, 2, 2, 2, 3, 3, 3, 3, 3]], dtype=jnp.int32),
        'obs_timestep_sequence': jnp.asarray(
            [[-4, -3, -2, -1, 0, -5, -4, -3, -2, -1, 0, -4, -3, -2, -1, 0]], dtype=jnp.int32),
        'valid_id': jnp.asarray([[1, 2, 3]], dtype=jnp.int32),
    }

    encoder = ContextEncoderPallas(ctx, k_enc)
    out = encoder(dict(data))
    jax.tree_util.tree_map(jax.block_until_ready, out)

    # Reference check (pure-JAX) for the fused linear + PE + bias hot path.
    seq = jnp.concatenate([data['obs_pos_sequence'], data['obs_vel_sequence']], axis=-1)[0]
    times = data['obs_timestep_sequence'][0]
    pos = jnp.take(encoder.pe, times + encoder.t_index_shift, axis=0)
    ref_enc = seq @ encoder.w_in + encoder.b_in + pos
    assert jnp.allclose(out['context_enc'][0], ref_enc, rtol=1e-3, atol=1e-3)

    # Reference check for grouped mean pooling (exact divide now; tighter than before).
    ids = data['obs_identity_sequence'][0]
    ref_pool = jnp.stack([ref_enc[ids == a].mean(axis=0) for a in [1, 2, 3]])
    assert jnp.allclose(out['agent_context'][0], ref_pool, rtol=2e-3, atol=2e-3)

    # Reference checks for the masks (exact).
    ref_src = jnp.where(times[:, None] < times[None, :], -jnp.inf, 0.0)
    assert jnp.array_equal(out['src_mask'][0], ref_src)
    ref_so = (ids[:, None] == ids[None, :]).astype(jnp.float32)
    assert jnp.array_equal(out['self_other_mask'][0], ref_so)

    assert out['context_enc'].shape == (1, T, ctx['tf_model_dim'])
    assert out['agent_context'].shape == (1, 3, ctx['tf_model_dim'])
    assert out['src_mask'].shape == (1, T, T)
    assert out['self_other_mask'].shape == (1, T, T)

    print("KERNEL_OK")
</pallas_src>

<mosaic_0001>
module attributes {stable_mosaic.version = 11 : i64} {
  func.func @kernel(%arg0: memref<16x25xf32, #tpu.memory_space<vmem>>, %arg1: memref<25x32xf32, #tpu.memory_space<vmem>>, %arg2: memref<16x3xi32, #tpu.memory_space<vmem>>, %arg3: memref<1x32xi32, #tpu.memory_space<vmem>>, %arg4: memref<16x32xf32, #tpu.memory_space<vmem>>, %arg5: memref<16x32xf32, #tpu.memory_space<vmem>>, %arg6: memref<3x32xf32, #tpu.memory_space<vmem>>) attributes {dimension_semantics = [], scalar_prefetch = 0 : i64, scratch_operands = 0 : i64, tpu.core_type = #tpu.core_type<tc>} {
    %0 = tpu.iota {dimensions = array<i32: 1>} : vector<16x25xi32>
    %c0 = arith.constant 0 : index
    %c0_0 = arith.constant 0 : index
    %1 = vector.load %arg2[%c0, %c0_0] : memref<16x3xi32, #tpu.memory_space<vmem>>, vector<16x1xi32>
    %c11_i32 = arith.constant 11 : i32
    %2 = vector.broadcast %c11_i32 : i32 to vector<16x1xi32>
    %3 = arith.addi %1, %2 : vector<16x1xi32>
    %4 = vector.broadcast %3 : vector<16x1xi32> to vector<16x25xi32>
    %5 = arith.cmpi eq, %0, %4 : vector<16x25xi32>
    %c24_i32 = arith.constant 24 : i32
    %6 = vector.broadcast %c24_i32 : i32 to vector<16x25xi32>
    %7 = arith.cmpi eq, %0, %6 : vector<16x25xi32>
    %8 = arith.ori %5, %7 : vector<16x25xi1>
    %c0_1 = arith.constant 0 : index
    %c0_2 = arith.constant 0 : index
    %9 = vector.load %arg0[%c0_1, %c0_2] : memref<16x25xf32, #tpu.memory_space<vmem>>, vector<16x25xf32>
    %10 = arith.extui %8 : vector<16x25xi1> to vector<16x25xi32>
    %11 = arith.sitofp %10 : vector<16x25xi32> to vector<16x25xf32>
    %12 = arith.addf %9, %11 : vector<16x25xf32>
    %c0_3 = arith.constant 0 : index
    %c0_4 = arith.constant 0 : index
    %13 = vector.load %arg1[%c0_3, %c0_4] : memref<25x32xf32, #tpu.memory_space<vmem>>, vector<25x32xf32>
    %cst = arith.constant dense<0.000000e+00> : vector<16x32xf32>
    %14 = tpu.matmul %12, %13, %cst {dimension_numbers = #tpu.dot_dimension_numbers<[1], [0], [0], [1], [0, 0, 1, 1], [], []>} : vector<16x25xf32>, vector<25x32xf32>, vector<16x32xf32> -> vector<16x32xf32>
    %c0_5 = arith.constant 0 : index
    %c0_6 = arith.constant 0 : index
    %15 = vector.load %arg4[%c0_5, %c0_6] : memref<16x32xf32, #tpu.memory_space<vmem>>, vector<16x32xf32>
    tpu.vector_store %arg4[%c0_5, %c0_6], %14 {strides = array<i32>} : memref<16x32xf32, #tpu.memory_space<vmem>>, vector<16x32xf32>,
    %c0_7 = arith.constant 0 : index
    %c0_8 = arith.constant 0 : index
    %16 = vector.load %arg3[%c0_7, %c0_8] : memref<1x32xi32, #tpu.memory_space<vmem>>, vector<1x32xi32>
    %17 = tpu.iota {dimensions = array<i32: 1>} : vector<16x32xi32>
    %c16_i32 = arith.constant 16 : i32
    %18 = vector.broadcast %c16_i32 : i32 to vector<16x32xi32>
    %19 = arith.cmpi sge, %17, %18 : vector<16x32xi32>
    %c0_9 = arith.constant 0 : index
    %c1 = arith.constant 1 : index
    %20 = vector.load %arg2[%c0_9, %c1] : memref<16x3xi32, #tpu.memory_space<vmem>>, vector<16x1xi32>
    %21 = vector.broadcast %20 : vector<16x1xi32> to vector<16x32xi32>
    %22 = vector.broadcast %16 : vector<1x32xi32> to vector<16x32xi32>
    %23 = arith.cmpi eq, %21, %22 : vector<16x32xi32>
    %24 = arith.extui %23 : vector<16x32xi1> to vector<16x32xi32>
    %25 = arith.sitofp %24 : vector<16x32xi32> to vector<16x32xf32>
    %c0_10 = arith.constant 0 : index
    %c0_11 = arith.constant 0 : index
    %26 = vector.load %arg2[%c0_10, %c0_11] : memref<16x3xi32, #tpu.memory_space<vmem>>, vector<16x1xi32>
    %27 = vector.broadcast %26 : vector<16x1xi32> to vector<16x32xi32>
    %28 = vector.broadcast %16 : vector<1x32xi32> to vector<16x32xi32>
    %29 = arith.cmpi slt, %27, %28 : vector<16x32xi32>
    %cst_12 = arith.constant 0xFF800000 : f32
    %cst_13 = arith.constant 0.000000e+00 : f32
    %30 = vector.broadcast %cst_12 : f32 to vector<16x32xf32>
    %31 = vector.broadcast %cst_13 : f32 to vector<16x32xf32>
    %32 = arith.select %29, %30, %31 : vector<16x32xi1>, vector<16x32xf32>
    %33 = arith.select %19, %32, %25 : vector<16x32xi1>, vector<16x32xf32>
    %c0_14 = arith.constant 0 : index
    %c0_15 = arith.constant 0 : index
    %34 = vector.load %arg5[%c0_14, %c0_15] : memref<16x32xf32, #tpu.memory_space<vmem>>, vector<16x32xf32>
    tpu.vector_store %arg5[%c0_14, %c0_15], %33 {strides = array<i32>} : memref<16x32xf32, #tpu.memory_space<vmem>>, vector<16x32xf32>,
    %c0_16 = arith.constant 0 : index
    %c2 = arith.constant 2 : index
    %35 = vector.load %arg2[%c0_16, %c2] : memref<16x3xi32, #tpu.memory_space<vmem>>, vector<3x1xi32>
    %c0_17 = arith.constant 0 : index
    %c0_18 = arith.constant 0 : index
    %36 = vector.load %arg3[%c0_17, %c0_18] : memref<1x32xi32, #tpu.memory_space<vmem>>, vector<1x16xi32>
    %37 = vector.broadcast %35 : vector<3x1xi32> to vector<3x16xi32>
    %38 = vector.broadcast %36 : vector<1x16xi32> to vector<3x16xi32>
    %39 = arith.cmpi eq, %37, %38 : vector<3x16xi32>
    %40 = arith.extui %39 : vector<3x16xi1> to vector<3x16xi32>
    %41 = arith.sitofp %40 : vector<3x16xi32> to vector<3x16xf32>
    %cst_19 = arith.constant dense<0.000000e+00> : vector<3xf32>
    %42 = vector.multi_reduction <add>, %41, %cst_19 [1] : vector<3x16xf32> to vector<3xf32>
    %43 = vector.shape_cast %42 : vector<3xf32> to vector<3x1xf32>
    %cst_20 = arith.constant dense<0.000000e+00> : vector<3x32xf32>
    %44 = tpu.matmul %41, %14, %cst_20 {dimension_numbers = #tpu.dot_dimension_numbers<[1], [0], [0], [1], [0, 0, 1, 1], [], []>} : vector<3x16xf32>, vector<16x32xf32>, vector<3x32xf32> -> vector<3x32xf32>
    %cst_21 = arith.constant 1.000000e+00 : f32
    %45 = vector.broadcast %cst_21 : f32 to vector<3x1xf32>
    %46 = arith.maximumf %43, %45 : vector<3x1xf32>
    %47 = vector.broadcast %46 : vector<3x1xf32> to vector<3x32xf32>
    %48 = arith.divf %44, %47 : vector<3x32xf32>
    %c0_22 = arith.constant 0 : index
    %c0_23 = arith.constant 0 : index
    %49 = vector.load %arg6[%c0_22, %c0_23] : memref<3x32xf32, #tpu.memory_space<vmem>>, vector<3x32xf32>
    tpu.vector_store %arg6[%c0_22, %c0_23], %48 {strides = array<i32>} : memref<3x32xf32, #tpu.memory_space<vmem>>, vector<3x32xf32>,
    return
  }
}

</mosaic_0001>

<bundles_post_ra>
// kernel: tpu_custom_call.1
= control target key start
LH: loop header
LB: loop body
LE: loop exit
PB: predicated region body
PF: predicated region fallthrough
CT: control target
= control target key end

     0   :  { %12 = vsyncpa [#allocation3], 0  ;;  %s477_s0 = inlined_call_operand.vmem [shape: f32[16,25], index: 0, kind: input, shape index: {}]   ;;  %s478_s1 = inlined_call_operand.hbm [shape: f32[25,32], index: 1, kind: input, shape index: {}]   ;;  %s479_s2 = inlined_call_operand.vmem [shape: s32[16,3], index: 2, kind: input, shape index: {}]   ;;  %s480_s3 = inlined_call_operand.vmem [shape: s32[1,32], index: 3, kind: input, shape index: {}]   ;;  %s481_s4 = inlined_call_operand.hbm [shape: f32[16,32], index: 4, kind: output, shape index: {0}]   ;;  %s482_s5 = inlined_call_operand.hbm [shape: f32[16,32], index: 5, kind: output, shape index: {1}]   ;;  %s483_s6 = inlined_call_operand.hbm [shape: f32[3,32], index: 6, kind: output, shape index: {2}]  }
   0x1   :  { %13 = vsyncpa [#allocation4], 0 }
   0x2   :  { %14 = vsyncpa [#allocation7], 0  ;;  %s21_s23 = sshll.u32 %s478_s1, 4  ;;  %s376_s24 = smov [#allocation2]   ;;  %s22_s23 = int_to_ptr.hbm [resolvable:$true] %s21_s23 }
   0x3   :  { %s23_s25 = sshll.u32 %s376_s24, 4  ;;  %s377_s26 = smov 128   ;;  %s24_s25 = int_to_ptr.vmem [resolvable:$true] %s23_s25 }
   0x4   :  { %s378_s27 = smov 8  }
   0x5   :  { %29 = dma.hbm_to_vmem [thread:$0]  %s22_s23, 512, %s24_s25, [#allocation3], %s377_s26, %s377_s26, %s378_s27  }
   0x6   :  { %370 = dma.done.wait [#allocation3], 512  }
   0x7   :  { %371 = vsyncadd [#allocation3], 4294966784  ;;  %v379_v0 = vmov 0   ;;  %v380_v1 = vmov 1   ;;  %v381_v2 = vmov 2   ;;  %vm74_vm0 = vcmask 1040384  }
   0x8   :  { %265 = vset.pattern.permute.xlu0 %v379_v0  ;;  %267 = vset.pattern.permute.xlu2 %v380_v1  ;;  %v41_v3 = vld [vmem:[%s479_s2 + $0x8] sm:$0xff]  ;;  %v40_v4 = vld [vmem:[%s479_s2] sm:$0xff]  ;;  %v66_v5 = vld [vmem:[#allocation2 + $0x18] sm:$0x1]  ;;  %v38_v12 = vlaneseq  ;;  %v382_v16 = vmov 0.0   ;;  %vm67_vm4 = vcmask 203776  }
   0x9   :  { %266 = vset.pattern.permute.xlu1 %v381_v2  ;;  %v43_v6 = vadd.s32 11, %v41_v3  ;;  %109 = vperm.xlu2 %267, %v40_v4   ;;  %v42_v7 = vadd.s32 11, %v40_v4  ;;  %v135_v8 = vld [vmem:[%s479_s2] sm:$0x7]  ;;  %v65_v9 = vld [vmem:[#allocation2 + $0x10] sm:$0xff]  ;;  %v64_v10 = vld [vmem:[#allocation2 + $0x8] sm:$0xff] }
   0xa   :  { %251 = vmatpush.msk.msra.mxu2 %vm74_vm0, %v66_v5  ;;  %244 = vmatpush.msk.msra.mxu0 %vm74_vm0, %v66_v5  ;;  %v63_v11 = vld [vmem:[#allocation2] sm:$0xff]  ;;  %v436_v13 = vand.u32 127, %v38_v12  ;;  %v56_v15 = vld [vmem:[%s477_s0 + $0x8] sm:$0xff]  ;;  %vm101_vm10 = vcmask 261120   ;;  %vm144_vm11 = vcmask 124928   ;;  %vm148_vm13 = vcmask 130048  }
   0xb   :  { %48 = vperm.xlu0 %265, %v43_v6   ;;  %138 = vperm.xlu1 %266, %v135_v8   ;;  %v55_v20 = vld [vmem:[%s477_s0] sm:$0xff]  ;;  %s383_s17 = smov [#allocation5]   ;;  %s384_s19 = smov [#allocation6]  }
   0xc   :  { %252 = vmatpush.msra.mxu2 %v65_v9  ;;  %91 = vmatpush.msra.mxu0 %v65_v9  ;;  %vm52_vm1 = vcmp.eq.s32.totalorder %v436_v13, 24  ;;  %v270_v21 = vld [vmem:[%s480_s3] ss:$0 sm:$0xff]  ;;  %vm105_vm8 = vcmp.ge.s32.totalorder %v436_v13, 16  ;;  %s194_s18 = sshll.u32 %s383_s17, 4  ;;  %s207_s20 = sshll.u32 %s384_s19, 4  ;;  %s195_s18 = int_to_ptr.vmem [resolvable:$true] %s194_s18  ;;  %s208_s20 = int_to_ptr.vmem [resolvable:$true] %s207_s20 }
   0xd   :  { %v271_v29 = vld [vmem:[%s480_s3] ss:$0 sm:$0xff]  ;;  %s196_s3 = sshll.u32 %s481_s4, 4  ;;  %s209_s23 = sshll.u32 %s482_s5, 4  ;;  %s197_s3 = int_to_ptr.hbm [resolvable:$true] %s196_s3  ;;  %s210_s23 = int_to_ptr.hbm [resolvable:$true] %s209_s23 }
   0xe   :  { %253 = vmatpush.msra.mxu2 %v64_v10  ;;  %92 = vmatpush.msra.mxu0 %v64_v10  ;;  %s385_s4 = smov [#allocation8]  }
   0xf   :  { %s221_s5 = sshll.u32 %s385_s4, 4  ;;  %s222_s5 = int_to_ptr.vmem [resolvable:$true] %s221_s5 }
  0x10   :  { %254 = vmatpush.msra.mxu2 %v63_v11  ;;  %93 = vmatpush.msra.mxu0 %v63_v11 }
  0x11   :  { %112 = vperm.xlu2 %267, %v41_v3  }
  0x13   :  { %45 = vperm.xlu0 %265, %v42_v7  }
  0x19   :  { %268 = vset.pattern.permute.xlu2 %v379_v0 }
  0x1a   :  { %125 = vperm.xlu2 %268, %v41_v3  }
  0x1b   :  { %122 = vperm.xlu0 %265, %v40_v4  }
  0x23   :  { %269 = vset.pattern.permute.xlu0 %v381_v2 }
  0x63   :  { %v110_v22 = vpop.permute.xlu2 %109 }
  0x64   :  { %vm115_vm7 = vcmp.eq.s32.totalorder %v110_v22, %v270_v21 }
  0x65   :  { %v247_v25 = vsel %vm115_vm7, 1.0, %v382_v16 }
  0x6b   :  { %v113_v35 = vpop.permute.xlu2 %112 }
  0x6c   :  { %vm116_vm14 = vcmp.eq.s32.totalorder %v113_v35, %v270_v21 }
  0x6d   :  { %v248_v36 = vsel %vm116_vm14, 1.0, %v382_v16 }
  0x74   :  { %v126_v37 = vpop.permute.xlu2 %125 }
  0x75   :  { %vm128_vm15 = vcmp.lt.s32.totalorder %v126_v37, %v270_v21 }
  0x76   :  { %v130_v38 = vsel %vm128_vm15, -inf, %v382_v16 }
  0x77   :  { %v132_v39 = vsel %vm105_vm8, %v130_v38, %v248_v36 }
  0x78   :  { %134 = vst.msk [vmem:[#allocation6 + $0x8] sm:$0xff] %vm101_vm10, %v132_v39 }
  0x7d   :  { %v49_v14 = vpop.permute.xlu0 %48  ;;  %v139_v30 = vpop.permute.xlu1 %138 }
  0x7e   :  { %vm51_vm2 = vcmp.eq.s32.totalorder %v436_v13, %v49_v14  ;;  %vm141_vm12 = vcmp.eq.s32.totalorder %v139_v30, %v271_v29 }
  0x7f   :  { %vm54_vm3 = vmor %vm51_vm2, %vm52_vm1  ;;  %v249_v31 = vsel %vm141_vm12, 1.0, %v382_v16 }
  0x80   :  { %v243_v17 = vsel %vm54_vm3, 1.0, %v382_v16  ;;  %v145_v32 = vsel %vm144_vm11, %v249_v31, 0.0 }
  0x81   :  { %v62_v18 = vadd.f32 %v243_v17, %v56_v15  ;;  %146 = vadd.xlane.f32.xlu1 %v145_v32 }
  0x83   :  { %246 = vmatmul.msk.f32.vlgmr.msra.gmra.mxu2 %vm67_vm4, %v62_v18 }
  0x85   :  { %v46_v19 = vpop.permute.xlu0 %45 }
  0x86   :  { %vm50_vm5 = vcmp.eq.s32.totalorder %v436_v13, %v46_v19 }
  0x87   :  { %vm53_vm6 = vmor %vm50_vm5, %vm52_vm1 }
  0x88   :  { %v242_v23 = vsel %vm53_vm6, 1.0, %v382_v16 }
  0x89   :  { %v61_v24 = vadd.f32 %v242_v23, %v55_v20 }
  0x8b   :  { %245 = vmatmul.msk.f32.vlgmr.msra.gmra.mxu0 %vm67_vm4, %v61_v24  ;;  %vm188_vm4 = vcmask 256000  }
  0x8d   :  { %v123_v26 = vpop.permute.xlu0 %122 }
  0x8e   :  { %vm127_vm9 = vcmp.lt.s32.totalorder %v123_v26, %v270_v21 }
  0x8f   :  { %v129_v27 = vsel %vm127_vm9, -inf, %v382_v16 }
  0x90   :  { %v131_v28 = vsel %vm105_vm8, %v129_v27, %v247_v25 }
  0x91   :  { %133 = vst.msk [vmem:[#allocation6] sm:$0xff] %vm101_vm10, %v131_v28 }
  0x92   :  { %215 = dma.vmem_to_hbm [thread:$0]  %s208_s20, 256, %s210_s23, [#allocation7], %s377_s26, %s377_s26, %s378_s27  }
  0xf4   :  { %v147_v40 = vpop.xlane.xlu1 %146 }
  0xf5   :  { %v172_v41 = vmax.f32 %v147_v40, 1.0 }
  0xf7   :  { %272 = vrcp.f32 %v172_v41  ;;  %vm178_vm0 = vweird.f32 %v172_v41  ;;  %v184_v46 = vand.u32 2147483648, %v172_v41  ;;  %v182_v48 = vand.u32 2147483647, %v172_v41 }
  0xf9   :  { %v185_v49 = vor.u32 1.1754944e-38, %v184_v46  ;;  %vm183_vm3 = vcmp.eq.f32.partialorder %v182_v48, 8.507059e+37 }
  0xfd   :  { %v273_v42 = vpop.eup %272 }
  0xfe   :  { %v174_v43 = vmul.f32 %v273_v42, %v172_v41  ;;  %vm179_vm1 = vweird.f32 %v273_v42 }
  0xff   :  { %vm180_vm2 = vmor %vm178_vm0, %vm179_vm1 }
 0x100   :  { %v175_v44 = vsub.f32 1.0, %v174_v43 }
 0x102   :  { %v176_v45 = vmul.f32 %v273_v42, %v175_v44 }
 0x104   :  { %v177_v47 = vadd.f32 %v273_v42, %v176_v45 }
 0x106   :  { %v98_v33 = vpop.f32.mrf.mxu2  ;;  %v181_v50 = vsel %vm180_vm2, %v273_v42, %v177_v47 }
 0x107   :  { %103 = vst.msk [vmem:[#allocation5 + $0x8] sm:$0xff] %vm101_vm10, %v98_v33  ;;  %166 = vmatpush.msra.mxu1 %v98_v33  ;;  %v186_v52 = vsel %vm183_vm3, %v185_v49, %v181_v50 }
 0x108   :  { %v95_v34 = vpop.f32.mrf.mxu0 }
 0x109   :  { %102 = vst.msk [vmem:[#allocation5] sm:$0xff] %vm101_vm10, %v95_v34  ;;  %167 = vmatpush.msra.mxu1 %v95_v34 }
 0x10a   :  { %250 = vmatmul.msk.f32.vlgmr.msra.gmra.mxu1 %vm148_vm13, %v249_v31  ;;  %202 = dma.vmem_to_hbm [thread:$0]  %s195_s18, 256, %s197_s3, [#allocation4], %s377_s26, %s377_s26, %s378_s27  }
 0x10b   :  { %s223_s26 = sshll.u32 %s483_s6, 4  ;;  %s224_s26 = int_to_ptr.hbm [resolvable:$true] %s223_s26 }
 0x187   :  { %v169_v51 = vpop.f32.mrf.mxu1 }
 0x188   :  { %v187_v53 = vmul.f32 %v186_v52, %v169_v51 }
 0x18a   :  { %189 = vst.msk [vmem:[#allocation8] sm:$0x7] %vm188_vm4, %v187_v53 }
 0x18b   :  { %226 = dma.vmem_to_hbm [thread:$0]  %s222_s5, 64, %s224_s26, [#allocation7]  }
 0x18c   :  { %372 = dma.done.wait [#allocation4], 256  }
 0x18d   :  { %373 = vsyncadd [#allocation4], 4294967040 }
 0x18e   :  { %374 = dma.done.wait [#allocation7], 320  }
 0x18f   :  { %375 = vsyncadd [#allocation7], 4294966976 }
 0x190   :  { %239 = vsyncpa [#allocation3], 1 }
 0x191   :  { %240 = vsyncpa [#allocation4], 1 }
 0x192   :  { %241 = vsyncpa [#allocation7], 1 }

</bundles_post_ra>
